<compile_context>
chip_gen: v7x
topology: tpu7x:2x2x1
jax: 0.10.0
libtpu: 0.0.40
codegen_flags: <defaults>
</compile_context>

<pallas_src>
import functools

import jax
import jax.numpy as jnp
from jax.experimental import pallas as pl
from jax.experimental.pallas import tpu as pltpu

_LANE = 128
_MAX_TILE = 16384                       # lanes per grid step (upper cap)
_VMEM_TILE_BUDGET = 24 * 1024 * 1024    # per-step working-set budget (bytes)
_VMEM_LIMIT = 48 * 1024 * 1024          # scoped-VMEM limit handed to Mosaic


def _round_up(x, m):
    return ((x + m - 1) // m) * m


def _pick_tile(num_classes, hw, max_tile):
    """Largest lane tile whose per-step footprint fits the VMEM budget.

    Per-lane footprint (bytes): double-buffered inputs (C logit rows + 2 aux
    rows), double-buffered 8-row accumulator, ~5 live (C, tile) f32 temporaries
    inside the kernel, plus a few (1, tile) rows of slack.
    """
    bytes_per_lane = 4 * (2 * (num_classes + 2) + 2 * 8 + 5 * num_classes + 8)
    tile = _VMEM_TILE_BUDGET // bytes_per_lane
    tile = min(tile, _MAX_TILE, max_tile, _round_up(hw, _LANE))
    tile = (tile // _LANE) * _LANE
    return max(tile, _LANE)


def _int_pow_or_none(x, g):
    """Trace-time fast path for small integer exponents (keeps work off EUP)."""
    if g == 0.0:
        return jnp.ones_like(x)
    if g == 1.0:
        return x
    if g == 2.0:
        return x * x
    if g == 3.0:
        return x * x * x
    return None


def _flip_loss_kernel(logits_ref, aux_ref, acc_ref, *,
                      gamma1, gamma2, ignore_index, num_classes, use_weights,
                      split_index, hw, tile, n_inner, needs_mask, exact_argmax):
    # acc rows: 0 sum(ce*w)  1 sum(ce)  2 sum(w over non-ignored)  3 count(nonign)
    #           4 count(disagree & nonign & insplit)
    #           5 count(disagree & win & nonign & insplit)   (rows 6,7: padding)
    @pl.when(pl.program_id(2) == 0)
    def _init():
        acc_ref[...] = jnp.zeros_like(acc_ref)

    logits = logits_ref[...].astype(jnp.float32)             # (C, T)
    C, T = logits.shape

    tgt = aux_ref[0:1, :].astype(jnp.int32)                   # pseudo labels (trunc ~ .long())

    # ---- softmax statistics over the class axis (no (C,T) probs tensor) ----
    m = jnp.max(logits, axis=0, keepdims=True)                # (1, T)
    e = jnp.exp(logits - m)                                   # (C, T)
    s = jnp.sum(e, axis=0, keepdims=True)                     # (1, T)
    lse = m + jnp.log(s)                                      # (1, T) logsumexp

    class_ids = jax.lax.broadcasted_iota(jnp.int32, (C, 1), 0)  # (C,1): no (C,T) int temp

    nonign = tgt != ignore_index
    if needs_mask:  # tail lanes of a partial block: treat as ignore_index
        start = (pl.program_id(1) * n_inner + pl.program_id(2)) * tile
        lane = jax.lax.broadcasted_iota(jnp.int32, (1, T), 1)
        nonign = nonign & (start + lane < hw)

    tgt_safe = jnp.where(nonign, tgt, 0)                      # temp[temp == ignore] = 0
    # single one-hot gather: logit at the pseudo label
    # TODO(synk): labels outside [0, C) (and != ignore_index) gather 0.0 here,
    # whereas torch's gather would pick class 0's logit.
    logit_tgt = jnp.sum(jnp.where(class_ids == tgt_safe, logits, 0.0),
                        axis=0, keepdims=True)                # (1, T)
    nonign_f = nonign.astype(jnp.float32)
    zrow = jnp.zeros_like(nonign_f)

    if not use_weights:
        # plain cross-entropy path: only rows 0 (sum ce) and 3 (count) are used
        ce = jnp.where(nonign, lse - logit_tgt, 0.0)
        acc_ref[...] += jnp.concatenate(
            [ce, zrow, zrow, nonign_f, zrow, zrow, zrow, zrow], axis=0)
        return

    confp = aux_ref[1:2, :].astype(jnp.float32)                # pseudo confidence
    insplit = pl.program_id(0) < split_index                   # scalar: image < split_index

    log_prob_tgt = logit_tgt - lse
    prob_cur = jnp.exp(log_prob_tgt)                           # softmax prob at pseudo label

    if exact_argmax:
        # first argmax (lowest class index achieving the row max), like torch
        dec_cur = jnp.min(jnp.where(logits >= m, class_ids, num_classes),
                          axis=0, keepdims=True)
        disagree = dec_cur != tgt
    else:
        disagree = logit_tgt < m        # differs from torch only on exact logit ties

    win = confp * s < 1.0               # == (max prob = 1/s) > confp; exact since s > 0
    flip = disagree & win & nonign & insplit     # labels flip only on [:split_index]

    # ---- dynamic weights (same assignment semantics as the PyTorch module) ----
    p1 = _int_pow_or_none(prob_cur, gamma1)
    if p1 is None:
        p1 = jnp.exp(gamma1 * log_prob_tgt)
    p2 = _int_pow_or_none(prob_cur, gamma2)
    if p2 is None:
        p2 = jnp.exp(gamma2 * log_prob_tgt)
    one_minus = 1.0 - confp
    q2 = _int_pow_or_none(one_minus, gamma2)
    if q2 is None:
        q2 = one_minus ** gamma2

    w = jnp.ones_like(prob_cur)
    w = jnp.where(~disagree, p1, w)
    w = jnp.where(disagree & win & nonign, q2, w)
    w = jnp.where(disagree & ~win, p2, w)
    w = jnp.where(insplit, w, 1.0)      # dynamic_weights[split_index:] = 1
    w = jnp.where(nonign, w, 0.0)       # ignored / out-of-range lanes contribute 0 (NaN-safe)

    # cross entropy on (possibly flipped) targets: the flipped-target logit is
    # exactly the row max, so no second one-hot gather is needed.
    # TODO(synk): if ignore_index < num_classes, a flip onto ignore_index should
    # drop out of CE under torch semantics; we keep the original nonign mask.
    logit_new = jnp.where(flip, m, logit_tgt)
    ce = jnp.where(nonign, lse - logit_new, 0.0)

    dis_f = (disagree & nonign & insplit).astype(jnp.float32)
    flip_f = flip.astype(jnp.float32)

    # one dense (8, T) read-modify-write instead of six sublane-masked ones
    acc_ref[...] += jnp.concatenate(
        [ce * w, ce, w, nonign_f, dis_f, flip_f, zrow, zrow], axis=0)


@functools.partial(
    jax.jit,
    static_argnames=("split_index", "gamma1", "gamma2", "ignore_index",
                     "max_tile", "exact_argmax"))
def flip_loss(inputs, targets, split_index=None, *, gamma1=0.0, gamma2=0.0,
              ignore_index=-100, max_tile=None, exact_argmax=True):
    """JAX/Pallas port of FlipLoss.forward. Returns (total_loss, stats).

    stats values are device scalars (no host sync / .item()); the wrapper is
    fully jittable. bf16 logits are accepted and upcast inside the kernel.
    """
    N, C, H, W = inputs.shape
    HW = H * W
    use_weights = (split_index is not None) and not (gamma1 == 0 and gamma2 == 0)

    logits = inputs.reshape(N, C, HW)                         # free view, no transpose
    if targets.ndim == 4:
        ch = 2 if targets.shape[1] >= 2 else 1
        aux = targets[:, :ch].reshape(N, ch, HW).astype(jnp.float32)
    else:
        aux = targets.reshape(N, 1, HW).astype(jnp.float32)
    A = aux.shape[1]
    if use_weights and A < 2:
        raise ValueError("FlipLoss weights path needs 4-D targets with a "
                         "confidence channel (N, 2, H, W).")

    tile = _pick_tile(C, HW, max_tile if max_tile else _MAX_TILE)
    n_tiles = -(-HW // tile)
    # split the pixel tiles into an outer parallel axis (keeps both v7x
    # TensorCores busy when N is small) and an inner accumulation axis.
    p_outer = 2 if (n_tiles >= 2 and n_tiles % 2 == 0) else 1
    n_inner = n_tiles // p_outer
    needs_mask = n_tiles * tile != HW

    kernel = functools.partial(
        _flip_loss_kernel,
        gamma1=float(gamma1), gamma2=float(gamma2),
        ignore_index=int(ignore_index), num_classes=C,
        use_weights=use_weights,
        split_index=int(split_index) if use_weights else 0,
        hw=HW, tile=tile, n_inner=n_inner,
        needs_mask=needs_mask, exact_argmax=bool(exact_argmax))

    acc = pl.pallas_call(
        kernel,
        out_shape=jax.ShapeDtypeStruct((N, p_outer, 8, tile), jnp.float32),
        grid_spec=pltpu.PrefetchScalarGridSpec(
            num_scalar_prefetch=0,
            grid=(N, p_outer, n_inner),
            in_specs=[
                pl.BlockSpec((None, C, tile),
                             lambda n, p, i: (n, 0, p * n_inner + i)),
                pl.BlockSpec((None, A, tile),
                             lambda n, p, i: (n, 0, p * n_inner + i)),
            ],
            out_specs=pl.BlockSpec((None, None, 8, tile),
                                   lambda n, p, i: (n, p, 0, 0))),
        compiler_params=pltpu.CompilerParams(
            dimension_semantics=("parallel", "parallel", "arbitrary"),
            vmem_limit_bytes=_VMEM_LIMIT),
    )(logits, aux)

    sums = acc.sum(axis=(0, 1, 3))                            # (8,) tiny reduction
    wce_sum, ce_sum, w_sum, count = sums[0], sums[1], sums[2], sums[3]
    dis_sum, win_sum = sums[4], sums[5]

    total_loss = wce_sum / count
    if use_weights:
        stats = {'disagree': dis_sum.astype(jnp.int32),
                 'current_win': win_sum.astype(jnp.int32),
                 'avg_weights': w_sum / count,
                 'loss': ce_sum / count}
    else:
        stats = {'disagree': -1, 'current_win': -1, 'avg_weights': 1.0,
                 'loss': wce_sum / count}
    return total_loss, stats


# ----------------------------- pure-JAX references -----------------------------

def _ref_flip_loss(inputs, targets, split_index, gamma1, gamma2, ignore_index):
    N, C, H, W = inputs.shape
    real_t = targets[:, 0].astype(jnp.int32)
    conf_pseudo = targets[:, 1]
    probs = jax.nn.softmax(inputs, axis=1)
    dec_cur = jnp.argmax(probs, axis=1)
    conf_cur = jnp.max(probs, axis=1)
    nonign = real_t != ignore_index
    safe = jnp.where(nonign, real_t, 0)
    prob_cur = jnp.take_along_axis(probs, safe[:, None], axis=1)[:, 0]
    disagree = dec_cur != real_t
    win = conf_cur > conf_pseudo
    insplit = (jnp.arange(N) < split_index)[:, None, None]
    flip = disagree & win & nonign & insplit
    new_t = jnp.where(flip, dec_cur, real_t)
    w = jnp.ones_like(conf_cur)
    w = jnp.where(~disagree, prob_cur ** gamma1, w)
    w = jnp.where(disagree & win & nonign, (1.0 - conf_pseudo) ** gamma2, w)
    w = jnp.where(disagree & ~win, prob_cur ** gamma2, w)
    w = jnp.where(insplit, w, 1.0)
    lse = jax.scipy.special.logsumexp(inputs, axis=1)
    new_nonign = new_t != ignore_index
    logit_t = jnp.take_along_axis(inputs, jnp.where(new_nonign, new_t, 0)[:, None],
                                  axis=1)[:, 0]
    ce = jnp.where(new_nonign, lse - logit_t, 0.0)
    count = nonign.sum()
    total = (ce * w).sum() / count
    return (total, ce.sum() / count, (w * nonign).sum() / count,
            (disagree & nonign & insplit).sum(),
            (disagree & win & nonign & insplit).sum())


def _ref_plain_ce(inputs, labels, ignore_index):
    lse = jax.scipy.special.logsumexp(inputs, axis=1)
    nonign = labels != ignore_index
    safe = jnp.where(nonign, labels, 0)
    logit_t = jnp.take_along_axis(inputs, safe[:, None], axis=1)[:, 0]
    ce = jnp.where(nonign, lse - logit_t, 0.0)
    return ce.sum() / nonign.sum()


if __name__ == "__main__":
    ignore_index = 255
    keys = jax.random.split(jax.random.PRNGKey(0), 3)

    def make_inputs(key, N, C, H, W):
        k1, k2, k3, k4 = jax.random.split(key, 4)
        logits = jax.random.normal(k1, (N, C, H, W), jnp.float32)
        labels = jax.random.randint(k2, (N, H, W), 0, C)
        labels = jnp.where(jax.random.bernoulli(k3, 0.1, (N, H, W)), ignore_index, labels)
        conf = jax.random.uniform(k4, (N, H, W), jnp.float32)
        targets = jnp.stack([labels.astype(jnp.float32), conf], axis=1)  # (N,2,H,W)
        return logits, labels, targets

    # case 1: dynamic-weight branch, single pixel tile per image
    logits, labels, targets = make_inputs(keys[0], 2, 8, 16, 16)
    total, stats = flip_loss(logits, targets, split_index=1,
                             gamma1=2.0, gamma2=1.0, ignore_index=ignore_index)
    jax.block_until_ready(total)
    r_total, r_loss, r_avgw, r_dis, r_win = _ref_flip_loss(
        logits, targets, 1, 2.0, 1.0, ignore_index)
    assert jnp.allclose(total, r_total, rtol=1e-4, atol=1e-5), (total, r_total)
    assert jnp.allclose(stats['loss'], r_loss, rtol=1e-4, atol=1e-5)
    assert jnp.allclose(stats['avg_weights'], r_avgw, rtol=1e-4, atol=1e-5)
    assert int(stats['disagree']) == int(r_dis)
    assert int(stats['current_win']) == int(r_win)

    # case 2: multi-tile accumulation with an unpadded ragged tail
    #         (HW=2304, tile forced to 512 -> 5 tiles, last one lane-masked),
    #         non-integer gamma1 exercising the exp(g*logp) path
    logits2, labels2, targets2 = make_inputs(keys[1], 2, 8, 48, 48)
    total2, stats2 = flip_loss(logits2, targets2, split_index=1,
                               gamma1=0.5, gamma2=2.0, ignore_index=ignore_index,
                               max_tile=512)
    jax.block_until_ready(total2)
    r2 = _ref_flip_loss(logits2, targets2, 1, 0.5, 2.0, ignore_index)
    assert jnp.allclose(total2, r2[0], rtol=1e-4, atol=1e-5), (total2, r2[0])
    assert int(stats2['disagree']) == int(r2[3])
    assert int(stats2['current_win']) == int(r2[4])

    # case 3: N=1 with the outer pixel-parallel axis active (4 tiles -> p_outer=2)
    logits3, labels3, targets3 = make_inputs(keys[2], 1, 6, 32, 32)
    total3, stats3 = flip_loss(logits3, targets3, split_index=1,
                               gamma1=1.0, gamma2=3.0, ignore_index=ignore_index,
                               max_tile=256)
    jax.block_until_ready(total3)
    r3 = _ref_flip_loss(logits3, targets3, 1, 1.0, 3.0, ignore_index)
    assert jnp.allclose(total3, r3[0], rtol=1e-4, atol=1e-5), (total3, r3[0])

    # case 4: plain cross-entropy branch (split_index=None)
    total4, stats4 = flip_loss(logits, targets, split_index=None,
                               gamma1=0.0, gamma2=0.0, ignore_index=ignore_index)
    jax.block_until_ready(total4)
    r4 = _ref_plain_ce(logits, labels, ignore_index)
    assert jnp.allclose(total4, r4, rtol=1e-4, atol=1e-5), (total4, r4)
    assert jnp.allclose(stats4['loss'], r4, rtol=1e-4, atol=1e-5)

    # case 5: bf16 logits flow straight through (upcast inside the kernel)
    logits_bf16 = logits.astype(jnp.bfloat16)
    total5, _ = flip_loss(logits_bf16, targets, split_index=1,
                          gamma1=2.0, gamma2=1.0, ignore_index=ignore_index)
    jax.block_until_ready(total5)
    r5 = _ref_flip_loss(logits_bf16.astype(jnp.float32), targets, 1, 2.0, 1.0,
                        ignore_index)[0]
    assert jnp.allclose(total5, r5, rtol=1e-4, atol=1e-4), (total5, r5)

    print("KERNEL_OK")
</pallas_src>

<mosaic_0001>
module attributes {stable_mosaic.version = 11 : i64} {
  func.func @_flip_loss_kernel(%arg0: i32, %arg1: i32, %arg2: i32, %arg3: memref<1x8x256xf32, #tpu.memory_space<vmem>>, %arg4: memref<1x2x256xf32, #tpu.memory_space<vmem>>, %arg5: memref<1x1x8x256xf32, #tpu.memory_space<vmem>>) attributes {dimension_semantics = [#tpu.dimension_semantics<parallel>, #tpu.dimension_semantics<parallel>, #tpu.dimension_semantics<arbitrary>], iteration_bounds = array<i64: 2, 1, 1>, scalar_prefetch = 0 : i64, scratch_operands = 0 : i64, tpu.core_type = #tpu.core_type<tc>, window_params = [{transform_indices = @transform_0, window_bounds = array<i64: 1, 8, 256>}, {transform_indices = @transform_1, window_bounds = array<i64: 1, 2, 256>}, {transform_indices = @transform_2, window_bounds = array<i64: 1, 1, 8, 256>}]} {
    %c0_i32 = arith.constant 0 : i32
    %0 = arith.cmpi eq, %arg2, %c0_i32 : i32
    %1 = arith.extui %0 : i1 to i32
    %c0_i32_0 = arith.constant 0 : i32
    %2 = arith.cmpi ne, %1, %c0_i32_0 : i32
    scf.if %2 {
      %cst_30 = arith.constant 0.000000e+00 : f32
      %88 = vector.broadcast %cst_30 : f32 to vector<8x256xf32>
      %c0_31 = arith.constant 0 : index
      %c0_32 = arith.constant 0 : index
      %c0_33 = arith.constant 0 : index
      %c0_34 = arith.constant 0 : index
      %89 = vector.load %arg5[%c0_31, %c0_32, %c0_33, %c0_34] : memref<1x1x8x256xf32, #tpu.memory_space<vmem>>, vector<1x1x8x256xf32>
      %90 = vector.shape_cast %89 : vector<1x1x8x256xf32> to vector<8x256xf32>
      %91 = vector.shape_cast %88 : vector<8x256xf32> to vector<1x1x8x256xf32>
      tpu.vector_store %arg5[%c0_31, %c0_32, %c0_33, %c0_34], %91 {strides = array<i32>} : memref<1x1x8x256xf32, #tpu.memory_space<vmem>>, vector<1x1x8x256xf32>,
    } else {
    }
    %c0 = arith.constant 0 : index
    %c0_1 = arith.constant 0 : index
    %c0_2 = arith.constant 0 : index
    %3 = vector.load %arg3[%c0, %c0_1, %c0_2] : memref<1x8x256xf32, #tpu.memory_space<vmem>>, vector<1x8x256xf32>
    %4 = vector.shape_cast %3 : vector<1x8x256xf32> to vector<8x256xf32>
    %c0_3 = arith.constant 0 : index
    %c0_4 = arith.constant 0 : index
    %c0_5 = arith.constant 0 : index
    %5 = vector.load %arg4[%c0_3, %c0_4, %c0_5] : memref<1x2x256xf32, #tpu.memory_space<vmem>>, vector<1x1x256xf32>
    %6 = vector.shape_cast %5 : vector<1x1x256xf32> to vector<1x256xf32>
    %7 = arith.fptosi %6 : vector<1x256xf32> to vector<1x256xi32>
    %cst = arith.constant dense<0xFF800000> : vector<256xf32>
    %8 = vector.multi_reduction <maximumf>, %4, %cst [0] : vector<8x256xf32> to vector<256xf32>
    %9 = vector.shape_cast %8 : vector<256xf32> to vector<1x256xf32>
    %10 = vector.broadcast %9 : vector<1x256xf32> to vector<8x256xf32>
    %11 = arith.subf %4, %10 : vector<8x256xf32>
    %12 = math.exp %11 : vector<8x256xf32>
    %cst_6 = arith.constant dense<0.000000e+00> : vector<256xf32>
    %13 = vector.multi_reduction <add>, %12, %cst_6 [0] : vector<8x256xf32> to vector<256xf32>
    %14 = vector.shape_cast %13 : vector<256xf32> to vector<1x256xf32>
    %15 = math.log %14 : vector<1x256xf32>
    %16 = arith.addf %9, %15 : vector<1x256xf32>
    %17 = tpu.iota {dimensions = array<i32: 0>} : vector<8x1xi32>
    %c255_i32 = arith.constant 255 : i32
    %18 = vector.broadcast %c255_i32 : i32 to vector<1x256xi32>
    %19 = arith.cmpi ne, %7, %18 : vector<1x256xi32>
    %c0_i32_7 = arith.constant 0 : i32
    %20 = vector.broadcast %c0_i32_7 : i32 to vector<1x256xi32>
    %21 = arith.select %19, %7, %20 : vector<1x256xi1>, vector<1x256xi32>
    %22 = vector.broadcast %17 : vector<8x1xi32> to vector<8x256xi32>
    %23 = vector.broadcast %21 : vector<1x256xi32> to vector<8x256xi32>
    %24 = arith.cmpi eq, %22, %23 : vector<8x256xi32>
    %cst_8 = arith.constant 0.000000e+00 : f32
    %25 = vector.broadcast %cst_8 : f32 to vector<8x256xf32>
    %26 = arith.select %24, %4, %25 : vector<8x256xi1>, vector<8x256xf32>
    %cst_9 = arith.constant dense<0.000000e+00> : vector<256xf32>
    %27 = vector.multi_reduction <add>, %26, %cst_9 [0] : vector<8x256xf32> to vector<256xf32>
    %28 = vector.shape_cast %27 : vector<256xf32> to vector<1x256xf32>
    %29 = arith.extui %19 : vector<1x256xi1> to vector<1x256xi32>
    %30 = arith.sitofp %29 : vector<1x256xi32> to vector<1x256xf32>
    %cst_10 = arith.constant 0.000000e+00 : f32
    %31 = vector.broadcast %cst_10 : f32 to vector<1x256xf32>
    %c0_11 = arith.constant 0 : index
    %c1 = arith.constant 1 : index
    %c0_12 = arith.constant 0 : index
    %32 = vector.load %arg4[%c0_11, %c1, %c0_12] : memref<1x2x256xf32, #tpu.memory_space<vmem>>, vector<1x1x256xf32>
    %33 = vector.shape_cast %32 : vector<1x1x256xf32> to vector<1x256xf32>
    %c1_i32 = arith.constant 1 : i32
    %34 = arith.cmpi slt, %arg0, %c1_i32 : i32
    %35 = arith.subf %28, %16 : vector<1x256xf32>
    %36 = math.exp %35 : vector<1x256xf32>
    %37 = vector.broadcast %9 : vector<1x256xf32> to vector<8x256xf32>
    %38 = arith.cmpf oge, %4, %37 : vector<8x256xf32>
    %c8_i32 = arith.constant 8 : i32
    %39 = vector.shape_cast %17 : vector<8x1xi32> to vector<8x1xi32>
    %40 = vector.broadcast %39 : vector<8x1xi32> to vector<8x256xi32>
    %41 = vector.broadcast %c8_i32 : i32 to vector<8x256xi32>
    %42 = arith.select %38, %40, %41 : vector<8x256xi1>, vector<8x256xi32>
    %cst_13 = arith.constant dense<2147483647> : vector<256xi32>
    %43 = vector.multi_reduction <minsi>, %42, %cst_13 [0] : vector<8x256xi32> to vector<256xi32>
    %44 = vector.shape_cast %43 : vector<256xi32> to vector<1x256xi32>
    %45 = arith.cmpi ne, %44, %7 : vector<1x256xi32>
    %46 = arith.mulf %33, %14 : vector<1x256xf32>
    %cst_14 = arith.constant 1.000000e+00 : f32
    %47 = vector.broadcast %cst_14 : f32 to vector<1x256xf32>
    %48 = arith.cmpf olt, %46, %47 : vector<1x256xf32>
    %49 = arith.andi %45, %48 : vector<1x256xi1>
    %50 = arith.andi %49, %19 : vector<1x256xi1>
    %51 = vector.broadcast %34 : i1 to vector<1x256xi1>
    %52 = arith.andi %50, %51 : vector<1x256xi1>
    %53 = arith.mulf %36, %36 : vector<1x256xf32>
    %cst_15 = arith.constant 1.000000e+00 : f32
    %54 = vector.broadcast %cst_15 : f32 to vector<1x256xf32>
    %55 = arith.subf %54, %33 : vector<1x256xf32>
    %cst_16 = arith.constant 1.000000e+00 : f32
    %56 = vector.broadcast %cst_16 : f32 to vector<1x256xf32>
    %cst_17 = arith.constant dense<true> : vector<1x256xi1>
    %57 = arith.xori %45, %cst_17 : vector<1x256xi1>
    %58 = arith.select %57, %53, %56 : vector<1x256xi1>, vector<1x256xf32>
    %59 = arith.andi %45, %48 : vector<1x256xi1>
    %60 = arith.andi %59, %19 : vector<1x256xi1>
    %61 = arith.select %60, %55, %58 : vector<1x256xi1>, vector<1x256xf32>
    %cst_18 = arith.constant dense<true> : vector<1x256xi1>
    %62 = arith.xori %48, %cst_18 : vector<1x256xi1>
    %63 = arith.andi %45, %62 : vector<1x256xi1>
    %64 = arith.select %63, %36, %61 : vector<1x256xi1>, vector<1x256xf32>
    %cst_19 = arith.constant 1.000000e+00 : f32
    %65 = vector.broadcast %cst_19 : f32 to vector<1x256xf32>
    %66 = arith.select %34, %64, %65 : vector<1x256xf32>
    %cst_20 = arith.constant 0.000000e+00 : f32
    %67 = vector.broadcast %cst_20 : f32 to vector<1x256xf32>
    %68 = arith.select %19, %66, %67 : vector<1x256xi1>, vector<1x256xf32>
    %69 = arith.select %52, %9, %28 : vector<1x256xi1>, vector<1x256xf32>
    %70 = arith.subf %16, %69 : vector<1x256xf32>
    %cst_21 = arith.constant 0.000000e+00 : f32
    %71 = vector.broadcast %cst_21 : f32 to vector<1x256xf32>
    %72 = arith.select %19, %70, %71 : vector<1x256xi1>, vector<1x256xf32>
    %73 = arith.andi %45, %19 : vector<1x256xi1>
    %74 = vector.broadcast %34 : i1 to vector<1x256xi1>
    %75 = arith.andi %73, %74 : vector<1x256xi1>
    %76 = arith.extui %75 : vector<1x256xi1> to vector<1x256xi32>
    %77 = arith.sitofp %76 : vector<1x256xi32> to vector<1x256xf32>
    %78 = arith.extui %52 : vector<1x256xi1> to vector<1x256xi32>
    %79 = arith.sitofp %78 : vector<1x256xi32> to vector<1x256xf32>
    %c0_22 = arith.constant 0 : index
    %c0_23 = arith.constant 0 : index
    %c0_24 = arith.constant 0 : index
    %c0_25 = arith.constant 0 : index
    %80 = vector.load %arg5[%c0_22, %c0_23, %c0_24, %c0_25] : memref<1x1x8x256xf32, #tpu.memory_space<vmem>>, vector<1x1x8x256xf32>
    %81 = vector.shape_cast %80 : vector<1x1x8x256xf32> to vector<8x256xf32>
    %82 = arith.mulf %72, %68 : vector<1x256xf32>
    %83 = tpu.concatenate %82, %72, %68, %30, %77, %79, %31, %31 in 0 : vector<1x256xf32>, vector<1x256xf32>, vector<1x256xf32>, vector<1x256xf32>, vector<1x256xf32>, vector<1x256xf32>, vector<1x256xf32>, vector<1x256xf32> -> vector<8x256xf32>
    %84 = arith.addf %81, %83 : vector<8x256xf32>
    %c0_26 = arith.constant 0 : index
    %c0_27 = arith.constant 0 : index
    %c0_28 = arith.constant 0 : index
    %c0_29 = arith.constant 0 : index
    %85 = vector.load %arg5[%c0_26, %c0_27, %c0_28, %c0_29] : memref<1x1x8x256xf32, #tpu.memory_space<vmem>>, vector<1x1x8x256xf32>
    %86 = vector.shape_cast %85 : vector<1x1x8x256xf32> to vector<8x256xf32>
    %87 = vector.shape_cast %84 : vector<8x256xf32> to vector<1x1x8x256xf32>
    tpu.vector_store %arg5[%c0_26, %c0_27, %c0_28, %c0_29], %87 {strides = array<i32>} : memref<1x1x8x256xf32, #tpu.memory_space<vmem>>, vector<1x1x8x256xf32>,
    return
  }
  func.func @transform_0(%arg0: i32, %arg1: i32, %arg2: i32) -> (i32, i32, i32) {
    %c1_i32 = arith.constant 1 : i32
    %0 = arith.muli %arg1, %c1_i32 : i32
    %1 = arith.addi %0, %arg2 : i32
    %c0_i32 = arith.constant 0 : i32
    %c0_i32_0 = arith.constant 0 : i32
    return %arg0, %c0_i32, %1 : i32, i32, i32
  }
  func.func @transform_1(%arg0: i32, %arg1: i32, %arg2: i32) -> (i32, i32, i32) {
    %c1_i32 = arith.constant 1 : i32
    %0 = arith.muli %arg1, %c1_i32 : i32
    %1 = arith.addi %0, %arg2 : i32
    %c0_i32 = arith.constant 0 : i32
    %c0_i32_0 = arith.constant 0 : i32
    return %arg0, %c0_i32, %1 : i32, i32, i32
  }
  func.func @transform_2(%arg0: i32, %arg1: i32, %arg2: i32) -> (i32, i32, i32, i32) {
    %c0_i32 = arith.constant 0 : i32
    %c0_i32_0 = arith.constant 0 : i32
    %c0_i32_1 = arith.constant 0 : i32
    return %arg0, %arg1, %c0_i32, %c0_i32_0 : i32, i32, i32, i32
  }
}

</mosaic_0001>

<bundles_post_ra>
// kernel: flip_loss.1
= control target key start
LH: loop header
LB: loop body
LE: loop exit
PB: predicated region body
PF: predicated region fallthrough
CT: control target
= control target key end

     0   :  { %s799_s9 = smov 0   ;;  %s801_s10 = smov 0   ;;  %s1044_s0 = inlined_call_operand.vmem [shape: f32[2,8,256], index: 0, kind: input, shape index: {}]   ;;  %s1045_s1 = inlined_call_operand.vmem [shape: f32[2,2,256], index: 1, kind: input, shape index: {}]   ;;  %s1046_s2 = inlined_call_operand.vmem [shape: f32[2,1,8,256], index: 2, kind: output, shape index: {}]  }
   0x1   :  { %s803_s11 = smov 0  }
   0x2 LB: > { %s31_s12 = sadd.s32 1, %s774_s10  ;;  %p696_p0 = scmp.ge.s32.totalorder %s778_s11, 1  ;;  %s778_s11 = sphi %s803_s11, %s12_s11   ;;  %s774_s10 = sphi %s801_s10, %s1072_s10   ;;  %s770_s9 = sphi %s799_s9, %s1071_s9  }
   0x3   : > { %p33_p1 = scmp.ge.s32.totalorder %s31_s12, 2  ;;  %p165_p2 = scmp.lt.s32.totalorder %s778_s11, 3 }
   0x5   : > { %s1074_s12 = smov (%p33_p1, %s31_s12), 0  ;;  %p166_p3 = pnand %p696_p0, %p165_p2 }
   0x6   : > { %p208_p4 = scmp.lt.s32.totalorder (!%p166_p3), %s770_s9, 1  ;;  %v285_v14 = vlaneseq (!%p166_p3)  ;;  %v780_v43 = vmov (!%p166_p3), 1966171168  }
   0x7   : > { %169 = sbr.rel (%p166_p3) target bundleno = 114 (0x72), region = 28  ;;  %v360_v44 = vunpack.c.l.s4 (!%p166_p3), %v780_v43 }
   0x8   : > { %v286_v20 = vshrl.u32 (!%p166_p3), %v285_v14, 7 }
   0x9   : > { %v361_v53 = vunpack.c.0.s8 (!%p166_p3), %v360_v44 }
   0xa   : > { %v848_v23 = vsub.s32 (!%p166_p3), 0, %v286_v20  ;;  %v854_v25 = vsub.s32 (!%p166_p3), 1, %v286_v20 }
   0xb   : > { %v858_v61 = vsub.s32 (!%p166_p3), %v361_v53, %v286_v20 }
   0xe   : > { %s823_s13 = scalar_select %p208_p4, %s770_s9, 1 }
   0xf   : > { %s401_s22 = scalar_select %p208_p4, 1, 0 }
  0x10   : > { %s711_s14 = sshll.u32 %s823_s13, 4  ;;  %s712_s15 = sshll.u32 %s823_s13, 2 }
  0x11   : > { %s215_s18 = scalar_lea.vmem %s1044_s0, %s711_s14  ;;  %s835_s21 = scalar_lea.vmem %s1045_s1, %s712_s15 }
  0x12   : > { %v245_v0 = vld [vmem:[%s215_s18] sm:$0xff]  ;;  %v246_v1 = vld [vmem:[%s215_s18 + $0x8] sm:$0xff]  ;;  %s238_s25 = scalar_lea.vmem %s1046_s2, %s711_s14 }
  0x13   : > { %v249_v2 = vrot.slane %v245_v0, 4  ;;  %v255_v3 = vrot.slane %v246_v1, 4  ;;  %v247_v6 = vld [vmem:[%s835_s21] ss:$2 sm:$0x3] }
  0x14   : > { %v714_v9 = vtrunc.f32 %v247_v6  ;;  %v862_v6 = vld [vmem:[%s835_s21 + $0x1] ss:$2 sm:$0x3] }
  0x15   : > { %v250_v4 = vmax.f32 %v245_v0, %v249_v2  ;;  %v256_v5 = vmax.f32 %v246_v1, %v255_v3  ;;  %v408_v53 = vsub.f32 1.0, %v862_v6 }
  0x16   : > { %v838_v15 = vcvt.f32.s32 %v714_v9 }
  0x17   : > { %v251_v7 = vrot.slane %v250_v4, 2  ;;  %v257_v8 = vrot.slane %v256_v5, 2 }
  0x18   : > { %vm287_vm0 = vcmp.ne.s32.totalorder %v838_v15, 255 }
  0x19   : > { %v252_v10 = vmax.f32 %v250_v4, %v251_v7  ;;  %v258_v11 = vmax.f32 %v256_v5, %v257_v8  ;;  %v288_v24 = vsel %vm287_vm0, %v838_v15, 0 }
  0x1a   : > { %v292_v28 = vrot.slane %v288_v24, %v848_v23  ;;  %v296_v29 = vrot.slane %v288_v24, %v854_v25 }
  0x1b   : > { %v253_v12 = vrot.slane %v252_v10, 1  ;;  %v259_v13 = vrot.slane %v258_v11, 1 }
  0x1c   : > { %vm297_vm3 = vcmp.eq.s32.totalorder %v286_v20, %v292_v28  ;;  %vm298_vm4 = vcmp.eq.s32.totalorder %v286_v20, %v296_v29 }
  0x1d   : > { %v840_v16 = vmax.f32 %v252_v10, %v253_v12  ;;  %v842_v17 = vmax.f32 %v258_v11, %v259_v13  ;;  %v299_v35 = vsel %vm297_vm3, %v245_v0, 0.0  ;;  %v300_v37 = vsel %vm298_vm4, %v246_v1, 0.0 }
  0x1e   : > { %v301_v42 = vrot.slane %v299_v35, 4  ;;  %v307_v46 = vrot.slane %v300_v37, 4  ;;  %v781_v10 = vmov 0   ;;  %v353_v13 = vrot.slane %v838_v15, %v854_v25 }
  0x1f   : > { %v261_v18 = vsub.f32 %v245_v0, %v840_v16  ;;  %v262_v19 = vsub.f32 %v246_v1, %v842_v17  ;;  %vm325_vm1 = vcmp.ge.f32.partialorder %v246_v1, %v842_v17  ;;  %vm324_vm2 = vcmp.ge.f32.partialorder %v245_v0, %v840_v16 }
  0x20   : > { %v327_v26 = vsel %vm325_vm1, %v286_v20, 8  ;;  %v326_v27 = vsel %vm324_vm2, %v286_v20, 8  ;;  %v302_v52 = vadd.f32 %v301_v42, %v299_v35  ;;  %v308_v55 = vadd.f32 %v307_v46, %v300_v37 }
  0x21   : > { %v263_v21 = vmul.f32 1.442695, %v261_v18  ;;  %v265_v22 = vmul.f32 1.442695, %v262_v19  ;;  %v337_v30 = vrot.slane %v327_v26, 4  ;;  %v328_v31 = vrot.slane %v326_v27, 4 }
  0x22   : > { %v303_v59 = vrot.slane %v302_v52, 2  ;;  %v309_v62 = vrot.slane %v308_v55, 2  ;;  %v313_v11 = vsel %vm287_vm0, 1, %v781_v10  ;;  %v349_v18 = vrot.slane %v838_v15, %v848_v23 }
  0x23   : > { %744 = vpow2.f32 %v263_v21  ;;  %vm338_vm5 = vcmp.lt.s32.totalorder %v327_v26, %v337_v30  ;;  %vm329_vm6 = vcmp.lt.s32.totalorder %v326_v27, %v328_v31  ;;  %v396_v24 = vrot.slane %v313_v11, %v854_v25 }
  0x24   : > { %746 = vpow2.f32 %v265_v22  ;;  %v339_v38 = vsel %vm338_vm5, %v327_v26, %v337_v30  ;;  %v330_v40 = vsel %vm329_vm6, %v326_v27, %v328_v31  ;;  %v304_v2 = vadd.f32 %v303_v59, %v302_v52 }
  0x25   : > { %v340_v47 = vrot.slane %v339_v38, 2  ;;  %v331_v49 = vrot.slane %v330_v40, 2  ;;  %v310_v5 = vadd.f32 %v309_v62, %v308_v55  ;;  %v392_v22 = vrot.slane %v313_v11, %v848_v23 }
  0x26   : > { %v305_v9 = vrot.slane %v304_v2, 1  ;;  %vm782_vm1 = vmmov 1   ;;  %vm907_vm5 = vcmp.ne.s32.totalorder %v396_v24, 0  ;;  %v421_v62 = vrot.slane %v408_v53, %v854_v25 }
  0x27   : > { %vm341_vm7 = vcmp.lt.s32.totalorder %v339_v38, %v340_v47  ;;  %vm332_vm8 = vcmp.lt.s32.totalorder %v330_v40, %v331_v49  ;;  %v311_v12 = vrot.slane %v310_v5, 1  ;;  %vm899_vm3 = vcmp.ne.s32.totalorder %v392_v22, 0 }
  0x28   : > { %v342_v60 = vsel %vm341_vm7, %v339_v38, %v340_v47  ;;  %v333_v63 = vsel %vm332_vm8, %v330_v40, %v331_v49  ;;  %v306_v29 = vadd.f32 %v305_v9, %v304_v2 }
  0x29   : > { %v343_v1 = vrot.slane %v342_v60, 1  ;;  %v334_v4 = vrot.slane %v333_v63, 1  ;;  %v312_v31 = vadd.f32 %v311_v12, %v310_v5 }
  0x2b   : > { %vm344_vm9 = vcmp.lt.s32.totalorder %v342_v60, %v343_v1  ;;  %vm335_vm10 = vcmp.lt.s32.totalorder %v333_v63, %v334_v4 }
  0x2c   : > { %v345_v14 = vsel %vm344_vm9, %v342_v60, %v343_v1  ;;  %v336_v21 = vsel %vm335_vm10, %v333_v63, %v334_v4 }
  0x2d   : > { %v745_v32 = vpop.eup %744  ;;  %vm879_vm12 = vcmp.ne.s32.totalorder %v345_v14, %v353_v13  ;;  %vm888_vm14 = vcmp.ne.s32.totalorder %v336_v21, %v349_v18  ;;  %v783_v18 = vmov 0.0  }
  0x2e   : > { %v747_v33 = vpop.eup %746  ;;  %v267_v34 = vrot.slane %v745_v32, 4 }
  0x2f   : > { %v273_v36 = vrot.slane %v747_v33, 4 }
  0x30   : > { %v268_v39 = vadd.f32 %v745_v32, %v267_v34 }
  0x31   : > { %v274_v41 = vadd.f32 %v747_v33, %v273_v36  ;;  %v402_v33 = vstv %s401_s22 }
  0x32   : > { %v269_v45 = vrot.slane %v268_v39, 2  ;;  %vm911_vm6 = vcmp.eq.s32.totalorder %v402_v33, 1 }
  0x33   : > { %v275_v48 = vrot.slane %v274_v41, 2 }
  0x34   : > { %v270_v50 = vadd.f32 %v269_v45, %v268_v39 }
  0x35   : > { %v276_v51 = vadd.f32 %v275_v48, %v274_v41 }
  0x36   : > { %v271_v54 = vrot.slane %v270_v50, 1 }
  0x37   : > { %v277_v56 = vrot.slane %v276_v51, 1 }
  0x38   : > { %v272_v57 = vadd.f32 %v271_v54, %v270_v50 }
  0x39   : > { %v278_v58 = vadd.f32 %v277_v56, %v276_v51 }
  0x3a   : > { %748 = vlog2.f32 %v272_v57 }
  0x3b   : > { %750 = vlog2.f32 %v278_v58  ;;  %v358_v0 = vcombine.low %v272_v57, %v278_v58  ;;  %v417_v58 = vrot.slane %v408_v53, %v848_v23 }
  0x3d   : > { %v365_v3 = vrot.slane %v358_v0, %v858_v61 }
  0x3f   : > { %v372_v7 = vrot.slane %v365_v3, %v858_v61 }
  0x41   : > { %v374_v8 = vmul.f32 %v862_v6, %v372_v7 }
  0x43   : > { %vm375_vm11 = vcmp.lt.f32.partialorder %v374_v8, 1.0 }
  0x44   : > { %v749_v19 = vpop.eup %748  ;;  %v376_v20 = vsel %vm375_vm11, 1, %v781_v10  ;;  %vm894_vm2 = vmxor %vm375_vm11, %vm782_vm1 }
  0x45   : > { %v751_v26 = vpop.eup %750  ;;  %v384_v27 = vrot.slane %v376_v20, %v854_v25  ;;  %v280_v28 = vmul.f32 0.6931472, %v749_v19  ;;  %v380_v30 = vrot.slane %v376_v20, %v848_v23  ;;  %v427_v49 = vsel %vm894_vm2, 1, %v781_v10  ;;  %vm409_vm2 = vmxor %vm888_vm14, %vm782_vm1 }
  0x46   : > { %v282_v34 = vmul.f32 0.6931472, %v751_v26  ;;  %v431_v52 = vrot.slane %v427_v49, %v848_v23  ;;  %v435_v54 = vrot.slane %v427_v49, %v854_v25  ;;  %v703_v19 = vsel %vm287_vm0, 1.0, %v783_v18 }
  0x47   : > { %vm883_vm13 = vcmp.ne.s32.totalorder %v384_v27, 0  ;;  %v283_v36 = vadd.f32 %v280_v28, %v840_v16  ;;  %vm385_vm15 = vcmp.ne.s32.totalorder %v380_v30, 0  ;;  %v542_v33 = vrot.slane %v703_v19, %v854_v25 }
  0x48   : > { %v284_v39 = vadd.f32 %v282_v34, %v842_v17  ;;  %vm388_vm4 = vmand %vm879_vm12, %vm883_vm13  ;;  %vm954_vm13 = vcmp.ne.s32.totalorder %v431_v52, 0 }
  0x49   : > { %v318_v41 = vsub.f32 %v306_v29, %v283_v36  ;;  %vm387_vm7 = vmand %vm888_vm14, %vm385_vm15  ;;  %vm959_vm15 = vcmp.ne.s32.totalorder %v435_v54, 0 }
  0x4a   : > { %v319_v44 = vsub.f32 %v312_v31, %v284_v39  ;;  %vm919_vm8 = vmand %vm387_vm7, %vm899_vm3 }
  0x4b   : > { %v320_v45 = vmul.f32 1.442695, %v318_v41  ;;  %vm925_vm9 = vmand %vm388_vm4, %vm907_vm5 }
  0x4c   : > { %v322_v47 = vmul.f32 1.442695, %v319_v44  ;;  %vm404_vm10 = vmand %vm919_vm8, %vm911_vm6 }
  0x4d   : > { %752 = vpow2.f32 %v320_v45  ;;  %vm1047_vm11 = vmand %vm925_vm9, %vm911_vm6  ;;  %v463_v50 = vsel %vm404_vm10, %v840_v16, %v306_v29  ;;  %v707_v27 = vsel %vm404_vm10, 1.0, %v783_v18 }
  0x4e   : > { %754 = vpow2.f32 %v322_v47  ;;  %v464_v51 = vsel %vm1047_vm11, %v842_v17, %v312_v31  ;;  %v465_v55 = vsub.f32 %v283_v36, %v463_v50  ;;  %vm410_vm4 = vmxor %vm879_vm12, %vm782_vm1  ;;  %v538_v31 = vrot.slane %v703_v19, %v848_v23 }
  0x4f   : > { %v466_v56 = vsub.f32 %v284_v39, %v464_v51  ;;  %vm438_vm7 = vmand %vm888_vm14, %vm954_vm13  ;;  %v553_v36 = vrot.slane %v707_v27, 3 }
  0x50   : > { %vm439_vm11 = vmand %vm879_vm12, %vm959_vm15 }
  0x51   : > { %v469_v17 = vcombine.low %v465_v55, %v466_v56  ;;  %vm486_vm1 = vmand %vm888_vm14, %vm899_vm3  ;;  %vm563_vm14 = vcmask 1042432   ;;  %vm566_vm3 = vcmask 1043456  }
  0x52   : > { %vm487_vm13 = vmand %vm879_vm12, %vm907_vm5  ;;  %vm560_vm12 = vcmask 1041408   ;;  %vm569_vm5 = vcmask 1044480  }
  0x53   : > { %v476_v4 = vrot.slane %v469_v17, %v858_v61  ;;  %vm489_vm15 = vmand %vm487_vm13, %vm911_vm6 }
  0x55   : > { %v483_v11 = vrot.slane %v476_v4, %v858_v61 }
  0x57   : > { %v753_v16 = vpop.eup %752  ;;  %v485_v14 = vsel %vm287_vm0, %v483_v11, 0.0 }
  0x58   : > { %v755_v60 = vpop.eup %754  ;;  %v406_v63 = vmul.f32 %v753_v16, %v753_v16  ;;  %v516_v24 = vrot.slane %v485_v14, %v848_v23  ;;  %v520_v26 = vrot.slane %v485_v14, %v854_v25 }
  0x59   : > { %v407_v0 = vmul.f32 %v755_v60, %v755_v60 }
  0x5a   : > { %v411_v1 = vsel %vm409_vm2, %v406_v63, 1.0  ;;  %vm557_vm2 = vcmask 1040384  }
  0x5b   : > { %v412_v2 = vsel %vm410_vm4, %v407_v0, 1.0  ;;  %v424_v3 = vsel %vm919_vm8, %v417_v58, %v411_v1  ;;  %vm575_vm8 = vcmask 1046528  }
  0x5c   : > { %v425_v5 = vsel %vm925_vm9, %v421_v62, %v412_v2  ;;  %v440_v6 = vsel %vm438_vm7, %v753_v16, %v424_v3 }
  0x5d   : > { %v441_v7 = vsel %vm439_vm11, %v755_v60, %v425_v5  ;;  %v442_v8 = vsel %vm911_vm6, %v440_v6, 1.0  ;;  %vm488_vm11 = vmand %vm486_vm1, %vm911_vm6 }
  0x5e   : > { %v443_v9 = vsel %vm911_vm6, %v441_v7, 1.0  ;;  %v705_v21 = vsel %vm488_vm11, 1.0, %v783_v18 }
  0x5f   : > { %v446_v10 = vcombine.low %v442_v8, %v443_v9  ;;  %v547_v34 = vrot.slane %v705_v21, 4 }
  0x61   : > { %v453_v12 = vrot.slane %v446_v10, %v858_v61 }
  0x63   : > { %v460_v13 = vrot.slane %v453_v12, %v858_v61  ;;  %v706_v61 = vsel %vm489_vm15, 1.0, %v783_v18 }
  0x64   : > { %v548_v35 = vrot.slane %v706_v61, 4 }
  0x65   : > { %v462_v20 = vsel %vm287_vm0, %v460_v13, 0.0  ;;  %vm1070_vm0 = vmand %vm925_vm9, %vm911_vm6  ;;  %vm572_vm6 = vcmask 1045504  }
  0x66   : > { %v500_v22 = vmul.f32 %v485_v14, %v462_v20  ;;  %v527_v28 = vrot.slane %v462_v20, %v848_v23  ;;  %v708_v15 = vsel %vm1070_vm0, 1.0, %v783_v18  ;;  %v531_v29 = vrot.slane %v462_v20, %v854_v25 }
  0x67   : > { %v554_v38 = vrot.slane %v708_v15, 3 }
  0x68   : > { %v505_v30 = vrot.slane %v500_v22, %v848_v23  ;;  %v509_v32 = vrot.slane %v500_v22, %v854_v25 }
  0x6a   : > { %v558_v37 = vsel %vm557_vm2, %v505_v30, %v516_v24  ;;  %v559_v39 = vsel %vm557_vm2, %v509_v32, %v520_v26 }
  0x6b   : > { %v561_v40 = vsel %vm560_vm12, %v558_v37, %v527_v28  ;;  %v562_v23 = vsel %vm560_vm12, %v559_v39, %v531_v29 }
  0x6c   : > { %v564_v41 = vsel %vm563_vm14, %v561_v40, %v538_v31  ;;  %v565_v42 = vsel %vm563_vm14, %v562_v23, %v542_v33 }
  0x6d   : > { %v567_v25 = vsel %vm566_vm3, %v564_v41, %v547_v34  ;;  %v568_v43 = vsel %vm566_vm3, %v565_v42, %v548_v35 }
  0x6e   : > { %v570_v44 = vsel %vm569_vm5, %v567_v25, %v553_v36  ;;  %v571_v45 = vsel %vm569_vm5, %v568_v43, %v554_v38 }
  0x6f   : > { %v573_v46 = vsel %vm572_vm6, %v570_v44, 0.0  ;;  %v574_v47 = vsel %vm572_vm6, %v571_v45, 0.0 }
  0x70   : > { %v576_v48 = vsel %vm575_vm8, %v573_v46, 0.0  ;;  %v577_v49 = vsel %vm575_vm8, %v574_v47, 0.0 }
  0x71   : > { %580 = vst [vmem:[%s238_s25] sm:$0xff] %v576_v48  ;;  %581 = vst [vmem:[%s238_s25 + $0x8] sm:$0xff] %v577_v49 }
  0x72 PF: > { %s12_s11 = sadd.s32 1, %s778_s11   ;;  %s1071_s9 = smov %s774_s10 }
  0x73   : > { %p9_p5 = scmp.ge.s32.totalorder %s12_s11, 4   ;;  %s1072_s10 = smov %s1074_s12 }
  0x75   :  { %11 = sbr.rel (!%p9_p5) target bundleno = 2 (0x2), region = 66 }

</bundles_post_ra>
